<compile_context>
chip_gen: v5e
topology: v5e:2x2
jax: 0.10.0
libtpu: 0.0.40
codegen_flags: <defaults>
</compile_context>

<pallas_src>
import jax
import jax.numpy as jnp
from jax.experimental import pallas as pl
from jax.experimental.pallas import tpu as pltpu

_VMEM = pltpu.MemorySpace.VMEM


# ----------------------------- parameter prep --------------------------------
# One-time layout work (outside the per-step hot path).

def prepare_ffnn_params(weight, bias):
    """weight: (H, I), bias: (H,) -> (W^T (I, H), bias (1, H))."""
    return weight.T, bias.reshape(1, -1)


def prepare_lstm_params(w_ih, w_hh, b_ih, b_hh):
    """PyTorch LSTM weights -> pre-transposed layout (one-time prep).

    w_ih: (4H, I), w_hh: (4H, H), b_*: (4H,)  (gate-major rows: i, f, g, o)
    Returns:
      wx: (I, 4H)  = W_ih^T   (columns gate-major i,f,g,o)
      wh: (H, 4H)  = W_hh^T
      b:  (1, 4H)  = b_ih + b_hh
    """
    return w_ih.T, w_hh.T, (b_ih + b_hh).reshape(1, -1)


# ----------------------------- shared gate math -------------------------------

def _lstm_gate_update(gates, c, H):
    """gates: (B, 4H) pre-activation, c: (B, H) -> (h_new, c_new).

    Activations are applied on the full (B, 4H) vreg with a static lane mask
    (tanh on the g block, sigmoid elsewhere); slices are only taken for the
    elementwise combine.
    """
    col = jax.lax.broadcasted_iota(jnp.int32, gates.shape, 1)
    g_mask = (col >= 2 * H) & (col < 3 * H)
    acts = jnp.where(g_mask, jnp.tanh(gates), jax.nn.sigmoid(gates))
    i_g = acts[:, 0 * H:1 * H]
    f_g = acts[:, 1 * H:2 * H]
    g_g = acts[:, 2 * H:3 * H]
    o_g = acts[:, 3 * H:4 * H]
    c_new = f_g * c + i_g * g_g
    h_new = o_g * jnp.tanh(c_new)
    return h_new, c_new


# ----------------------------- ffnn kernel ------------------------------------

def _ffnn_kernel(x_ref, wt_ref, b_ref, out_ref):
    y = jnp.dot(x_ref[...], wt_ref[...],
                preferred_element_type=jnp.float32) + b_ref[...]
    out_ref[...] = jnp.tanh(y).astype(out_ref.dtype)


def ffnn_forward(x, wt, b2):
    """x: (B, I), wt: (I, H) pre-transposed, b2: (1, H) -> tanh(x @ W^T + b).

    If invoked per timestep, batch across time (pass X of shape (T*B, I)) so
    one pallas_call amortizes launch overhead.
    """
    B = x.shape[0]
    H = wt.shape[1]
    return pl.pallas_call(
        _ffnn_kernel,
        out_shape=jax.ShapeDtypeStruct((B, H), jnp.float32),
        in_specs=[pl.BlockSpec(memory_space=_VMEM)] * 3,
        out_specs=pl.BlockSpec(memory_space=_VMEM),
    )(x, wt, b2)


# --------------------------- lstm single-step kernel --------------------------

def _lstm_step_kernel(x_ref, h_ref, c_ref, wx_ref, wh_ref, b_ref,
                      y_ref, hn_ref, cn_ref):
    H = h_ref.shape[1]
    # Two lane-dense matmuls against resident weights (no wrapper concat):
    # gates = x @ W_ih^T + h @ W_hh^T + b, output (B, 4H) = 128 lanes.
    gates = (jnp.dot(x_ref[...], wx_ref[...], preferred_element_type=jnp.float32)
             + jnp.dot(h_ref[...], wh_ref[...], preferred_element_type=jnp.float32)
             + b_ref[...])
    h_new, c_new = _lstm_gate_update(gates, c_ref[...], H)
    y_ref[...] = jnp.tanh(h_new)              # module's final tanh
    hn_ref[...] = h_new
    cn_ref[...] = c_new


def lstm_step(x, h, c, wx, wh, b):
    """One LSTM step + tanh. x: (B, I); h, c: (B, H); params from
    prepare_lstm_params. Returns (tanh(h_new), (h_new, c_new))."""
    B = x.shape[0]
    H = h.shape[1]
    y, h_new, c_new = pl.pallas_call(
        _lstm_step_kernel,
        out_shape=(
            jax.ShapeDtypeStruct((B, H), jnp.float32),
            jax.ShapeDtypeStruct((B, H), jnp.float32),
            jax.ShapeDtypeStruct((B, H), jnp.float32),
        ),
        in_specs=[pl.BlockSpec(memory_space=_VMEM)] * 6,
        out_specs=(pl.BlockSpec(memory_space=_VMEM),) * 3,
    )(x, h, c, wx, wh, b)
    return y, (h_new, c_new)


# ----------------------- lstm whole-sequence kernel ---------------------------
# Single grid point: whole xs resident in VMEM, x-projection hoisted out of the
# recurrence, static unrolled time loop, outputs written back once at the end.

def _lstm_seq_kernel(xs_ref, h0_ref, c0_ref, wx_ref, wh_ref, b_ref,
                     out_ref, hn_ref, cn_ref):
    T, B, I = xs_ref.shape
    H = h0_ref.shape[1]

    # Hoisted input projection: one (T*B, I) @ (I, 4H) lane-dense MXU matmul,
    # off the serial h -> gates -> h dependency chain.
    gx = jnp.dot(xs_ref[...].reshape(T * B, I), wx_ref[...],
                 preferred_element_type=jnp.float32).reshape(T, B, 4 * H)

    wh = wh_ref[...]
    b = b_ref[...]
    h = h0_ref[...]
    c = c0_ref[...]

    # Static unrolled time loop (T is small and known at trace time).
    for t in range(T):
        gates = gx[t] + jnp.dot(h, wh, preferred_element_type=jnp.float32) + b
        h, c = _lstm_gate_update(gates, c, H)
        out_ref[t] = jnp.tanh(h)

    hn_ref[...] = h
    cn_ref[...] = c


def lstm_forward_seq(xs, h0, c0, wx, wh, b):
    """Step the controller over a sequence in one kernel (single grid point).

    xs: (T, B, I); h0, c0: (B, H). Returns (tanh outputs (T, B, H), (hT, cT)).
    """
    T, B, _ = xs.shape
    H = h0.shape[1]
    out, hN, cN = pl.pallas_call(
        _lstm_seq_kernel,
        out_shape=(
            jax.ShapeDtypeStruct((T, B, H), jnp.float32),
            jax.ShapeDtypeStruct((B, H), jnp.float32),
            jax.ShapeDtypeStruct((B, H), jnp.float32),
        ),
        in_specs=[pl.BlockSpec(memory_space=_VMEM)] * 6,
        out_specs=(pl.BlockSpec(memory_space=_VMEM),) * 3,
    )(xs, h0, c0, wx, wh, b)
    return out, (hN, cN)


# --------------------------- pure-JAX references -----------------------------

def _ffnn_ref(x, weight, bias):
    return jnp.tanh(x @ weight.T + bias)


def _lstm_cell_ref(x, h, c, w_ih, w_hh, b_ih, b_hh):
    H = h.shape[1]
    gates = x @ w_ih.T + b_ih + h @ w_hh.T + b_hh
    i_g = jax.nn.sigmoid(gates[:, 0 * H:1 * H])
    f_g = jax.nn.sigmoid(gates[:, 1 * H:2 * H])
    g_g = jnp.tanh(gates[:, 2 * H:3 * H])
    o_g = jax.nn.sigmoid(gates[:, 3 * H:4 * H])
    c_new = f_g * c + i_g * g_g
    h_new = o_g * jnp.tanh(c_new)
    return h_new, c_new


def _lstm_ref(x, h0, c0, w_ih, w_hh, b_ih, b_hh):
    h_new, _ = _lstm_cell_ref(x, h0, c0, w_ih, w_hh, b_ih, b_hh)
    return jnp.tanh(h_new)


def _lstm_seq_ref(xs, h0, c0, w_ih, w_hh, b_ih, b_hh):
    h, c = h0, c0
    outs = []
    for t in range(xs.shape[0]):
        h, c = _lstm_cell_ref(xs[t], h, c, w_ih, w_hh, b_ih, b_hh)
        outs.append(jnp.tanh(h))
    return jnp.stack(outs, axis=0), (h, c)


# --------------------------------- main --------------------------------------

if __name__ == "__main__":
    key = jax.random.PRNGKey(0)
    batch_size = 8
    input_size = 16
    hidden_size = 32
    seq_len = 6

    k = jax.random.split(key, 10)

    # ---------------- ffnn controller ----------------
    # xavier_normal weight, nn.Linear default uniform bias (matches module init).
    xavier_std = (2.0 / (input_size + hidden_size)) ** 0.5
    ffnn_w = xavier_std * jax.random.normal(k[0], (hidden_size, input_size),
                                            dtype=jnp.float32)
    bound = 1.0 / (input_size ** 0.5)
    ffnn_b = jax.random.uniform(k[1], (hidden_size,), jnp.float32, -bound, bound)
    x_ffnn = jax.random.normal(k[2], (batch_size, input_size), dtype=jnp.float32)

    ffnn_wt, ffnn_b2 = prepare_ffnn_params(ffnn_w, ffnn_b)   # one-time prep
    y_ffnn = jax.block_until_ready(ffnn_forward(x_ffnn, ffnn_wt, ffnn_b2))
    assert jnp.allclose(y_ffnn, _ffnn_ref(x_ffnn, ffnn_w, ffnn_b),
                        atol=1e-5, rtol=1e-5)

    # ---------------- lstm controller ----------------
    # init_parameters(): weights ~ U(-stdev, stdev), biases = 0.
    stdev = 5.0 / ((input_size + hidden_size) ** 0.5)
    w_ih = jax.random.uniform(k[3], (4 * hidden_size, input_size),
                              jnp.float32, -stdev, stdev)
    w_hh = jax.random.uniform(k[4], (4 * hidden_size, hidden_size),
                              jnp.float32, -stdev, stdev)
    b_ih = jnp.zeros((4 * hidden_size,), jnp.float32)
    b_hh = jnp.zeros((4 * hidden_size,), jnp.float32)

    # hidden0 / cell0 params (num_layers=1), repeated over batch (_init_hidden).
    hidden0 = 0.05 * jax.random.normal(k[5], (1, 1, hidden_size), dtype=jnp.float32)
    cell0 = 0.05 * jax.random.normal(k[6], (1, 1, hidden_size), dtype=jnp.float32)
    h0 = jnp.broadcast_to(hidden0[0], (batch_size, hidden_size))
    c0 = jnp.broadcast_to(cell0[0], (batch_size, hidden_size))

    wx, wh, b_cat = prepare_lstm_params(w_ih, w_hh, b_ih, b_hh)  # one-time prep

    # Single step (matches the module's forward exactly).
    x_lstm = jax.random.normal(k[7], (batch_size, input_size), dtype=jnp.float32)
    y_lstm, (h_new, c_new) = lstm_step(x_lstm, h0, c0, wx, wh, b_cat)
    y_lstm = jax.block_until_ready(y_lstm)
    assert jnp.allclose(y_lstm, _lstm_ref(x_lstm, h0, c0, w_ih, w_hh, b_ih, b_hh),
                        atol=1e-5, rtol=1e-5)
    h_ref, c_ref = _lstm_cell_ref(x_lstm, h0, c0, w_ih, w_hh, b_ih, b_hh)
    assert jnp.allclose(h_new, h_ref, atol=1e-5, rtol=1e-5)
    assert jnp.allclose(c_new, c_ref, atol=1e-5, rtol=1e-5)

    # Whole sequence in one kernel (typical stepped usage of the controller).
    xs = jax.random.normal(k[8], (seq_len, batch_size, input_size),
                           dtype=jnp.float32)
    ys_seq, (hT, cT) = lstm_forward_seq(xs, h0, c0, wx, wh, b_cat)
    ys_seq = jax.block_until_ready(ys_seq)
    ys_ref, (hT_ref, cT_ref) = _lstm_seq_ref(xs, h0, c0, w_ih, w_hh, b_ih, b_hh)
    assert jnp.allclose(ys_seq, ys_ref, atol=1e-4, rtol=1e-4)
    assert jnp.allclose(hT, hT_ref, atol=1e-4, rtol=1e-4)
    assert jnp.allclose(cT, cT_ref, atol=1e-4, rtol=1e-4)

    print("KERNEL_OK")
</pallas_src>

<mosaic_0001>
module attributes {stable_mosaic.version = 11 : i64} {
  func.func @_ffnn_kernel(%arg0: memref<8x16xf32, #tpu.memory_space<vmem>>, %arg1: memref<16x32xf32, #tpu.memory_space<vmem>>, %arg2: memref<1x32xf32, #tpu.memory_space<vmem>>, %arg3: memref<8x32xf32, #tpu.memory_space<vmem>>) attributes {dimension_semantics = [], scalar_prefetch = 0 : i64, scratch_operands = 0 : i64, tpu.core_type = #tpu.core_type<tc>} {
    %c0 = arith.constant 0 : index
    %c0_0 = arith.constant 0 : index
    %0 = vector.load %arg0[%c0, %c0_0] : memref<8x16xf32, #tpu.memory_space<vmem>>, vector<8x16xf32>
    %c0_1 = arith.constant 0 : index
    %c0_2 = arith.constant 0 : index
    %1 = vector.load %arg1[%c0_1, %c0_2] : memref<16x32xf32, #tpu.memory_space<vmem>>, vector<16x32xf32>
    %cst = arith.constant dense<0.000000e+00> : vector<8x32xf32>
    %2 = tpu.matmul %0, %1, %cst {dimension_numbers = #tpu.dot_dimension_numbers<[1], [0], [0], [1], [0, 0, 1, 1], [], []>} : vector<8x16xf32>, vector<16x32xf32>, vector<8x32xf32> -> vector<8x32xf32>
    %c0_3 = arith.constant 0 : index
    %c0_4 = arith.constant 0 : index
    %3 = vector.load %arg2[%c0_3, %c0_4] : memref<1x32xf32, #tpu.memory_space<vmem>>, vector<1x32xf32>
    %4 = vector.broadcast %3 : vector<1x32xf32> to vector<8x32xf32>
    %5 = arith.addf %2, %4 : vector<8x32xf32>
    %6 = math.tanh %5 : vector<8x32xf32>
    %c0_5 = arith.constant 0 : index
    %c0_6 = arith.constant 0 : index
    %7 = vector.load %arg3[%c0_5, %c0_6] : memref<8x32xf32, #tpu.memory_space<vmem>>, vector<8x32xf32>
    tpu.vector_store %arg3[%c0_5, %c0_6], %6 {strides = array<i32>} : memref<8x32xf32, #tpu.memory_space<vmem>>, vector<8x32xf32>,
    return
  }
}

</mosaic_0001>

<bundles_post_ra>
// kernel: tpu_custom_call.1
= control target key start
LH: loop header
LB: loop body
LE: loop exit
PB: predicated region body
PF: predicated region fallthrough
CT: control target
= control target key end

     0   :  { %8 = vsyncpa [#allocation3], 0  ;;  %s221_s0 = inlined_call_operand.hbm [shape: f32[8,16], index: 0, kind: input, shape index: {}]   ;;  %s222_s1 = inlined_call_operand.hbm [shape: f32[16,32], index: 1, kind: input, shape index: {}]   ;;  %s223_s2 = inlined_call_operand.vmem [shape: f32[1,32], index: 2, kind: input, shape index: {}]   ;;  %s224_s3 = inlined_call_operand.hbm [shape: f32[8,32], index: 3, kind: output, shape index: {}]  }
   0x1   :  { %9 = vsyncpa [#allocation6], 0 }
   0x2   :  { %10 = vsyncpa [#allocation4], 0  ;;  %s16_s14 = sshll.u32 %s221_s0, 4  ;;  %s184_s15 = smov [#allocation2]   ;;  %s17_s14 = int_to_ptr.hbm [resolvable:$true] %s16_s14 }
   0x3   :  { %s18_s16 = sshll.u32 %s184_s15, 4  ;;  %s26_s19 = sshll.u32 %s222_s1, 4  ;;  %s19_s16 = int_to_ptr.vmem [resolvable:$true] %s18_s16  ;;  %s27_s19 = int_to_ptr.hbm [resolvable:$true] %s26_s19 }
   0x4   :  { %21 = dma.hbm_to_vmem [thread:$0]  %s17_s14, 128, %s19_s16, [#allocation3]  }
   0x5   :  { %s185_s20 = smov [#allocation5]   ;;  %s186_s22 = smov 128  }
   0x6   :  { %s28_s21 = sshll.u32 %s185_s20, 4  ;;  %s187_s23 = smov 8   ;;  %s29_s21 = int_to_ptr.vmem [resolvable:$true] %s28_s21 }
   0x7   :  { %34 = dma.hbm_to_vmem [thread:$0]  %s27_s19, 256, %s29_s21, [#allocation6], %s186_s22, %s186_s22, %s187_s23  }
   0x8   :  { %178 = dma.done.wait [#allocation3], 128  }
   0x9   :  { %179 = vsyncadd [#allocation3], 4294967168 }
   0xa   :  { %180 = dma.done.wait [#allocation6], 256  }
   0xb   :  { %181 = vsyncadd [#allocation6], 4294967040  ;;  %v47_v0 = vld [vmem:[#allocation5 + $0x8] sm:$0xff]  ;;  %v46_v1 = vld [vmem:[#allocation5] sm:$0xff]  ;;  %vm52_vm0 = vcmask 130048   ;;  %s188_s24 = smov [#allocation7]  }
   0xc   :  { %70 = vmatpush.msra.mxu0 %v47_v0  ;;  %v45_v2 = vld [vmem:[#allocation2] sm:$0xff]  ;;  %s84_s25 = sshll.u32 %s188_s24, 4  ;;  %s86_s28 = sshll.u32 %s224_s3, 4  ;;  %vm77_vm1 = vcmask 261120   ;;  %s85_s25 = int_to_ptr.vmem [resolvable:$true] %s84_s25  ;;  %s87_s28 = int_to_ptr.hbm [resolvable:$true] %s86_s28 }
   0xd   :  { %v103_v3 = vld [vmem:[%s223_s2] ss:$0 sm:$0xff] }
   0xe   :  { %71 = vmatpush.msra.mxu0 %v46_v1 }
   0xf   :  { %97 = vmatmul.msk.f32.vlgmr.msra.gmra.mxu0 %vm52_vm0, %v45_v2 }
  0x8c   :  { %v73_v4 = vpop.f32.mrf.mxu0 }
  0x8d   :  { %v74_v5 = vadd.f32 %v103_v3, %v73_v4 }
  0x8f   :  { %104 = vtanh.f32 %v74_v5 }
  0x95   :  { %v105_v6 = vpop.eup %104 }
  0x96   :  { %78 = vst.msk [vmem:[#allocation7] sm:$0xff] %vm77_vm1, %v105_v6 }
  0x97   :  { %89 = dma.vmem_to_hbm [thread:$0]  %s85_s25, 128, %s87_s28, [#allocation4]  }
  0x98   :  { %182 = dma.done.wait [#allocation4], 128  }
  0x99   :  { %183 = vsyncadd [#allocation4], 4294967168 }
  0x9a   :  { %94 = vsyncpa [#allocation3], 1 }
  0x9b   :  { %95 = vsyncpa [#allocation6], 1 }
  0x9c   :  { %96 = vsyncpa [#allocation4], 1 }

</bundles_post_ra>
